<compile_context>
chip_gen: v7x
topology: tpu7x:2x2x1
jax: 0.10.0
libtpu: 0.0.40
codegen_flags: <defaults>
</compile_context>

<pallas_src>
import functools

import jax
import jax.numpy as jnp
from jax.experimental import pallas as pl
from jax.experimental.pallas import tpu as pltpu

LANE = 128  # TPU lane width


def _round_up(a: int, m: int) -> int:
    return ((a + m - 1) // m) * m


def policy_kernel(x_ref, wc_ref, o_ref, *, pi_out: int):
    # Single fused matmul: [TB, pi_in] @ [pi_in, PAD_OUT] -> [TB, PAD_OUT]  (MXU)
    logits = jnp.dot(x_ref[...], wc_ref[...], preferred_element_type=jnp.float32)

    # Mask the padding lanes (columns >= pi_out) so the softmax ignores them.
    col = jax.lax.broadcasted_iota(jnp.int32, logits.shape, 1)
    logits = jnp.where(col < pi_out, logits, -jnp.inf)

    # Numerically-stable softmax over the (padded) pi_out axis.
    m = jnp.max(logits, axis=-1, keepdims=True)
    e = jnp.exp(logits - m)
    denom = jnp.sum(e, axis=-1, keepdims=True)
    # Exact reciprocal on the EUP path (use approx=True if tolerance allows).
    o_ref[...] = (e * pl.reciprocal(denom, approx=False)).astype(o_ref.dtype)


def prepare_policy_weights(w1, w2):
    """One-time weight prep (hoisted out of the per-call path).

    w1: [256, pi_in], w2: [pi_out, 256]  (PyTorch nn.Linear layout)
    Returns (wc_padded [pi_in, round_up(pi_out, 128)], pi_out).
    The two bias-free linears have no nonlinearity between them, so they
    collapse exactly into Wc = W1.T @ W2.T.
    """
    wc = jnp.dot(w1.T, w2.T, preferred_element_type=jnp.float32)  # [pi_in, pi_out]
    pi_in, pi_out = wc.shape
    pad_out = _round_up(pi_out, LANE)
    wc_padded = jnp.zeros((pi_in, pad_out), jnp.float32).at[:, :pi_out].set(wc)
    return wc_padded, pi_out


def policy_network_forward(x, wc_padded, pi_out, *, block_b: int = 128):
    """x: [B, pi_in] (or 1-D [pi_in]) f32; wc_padded: [pi_in, pad_out] f32."""
    squeeze = x.ndim == 1
    if squeeze:
        x = x[None, :]
    B, pi_in = x.shape
    pad_out = wc_padded.shape[1]

    # Batch tile: multiple of 8 sublanes, at most block_b rows per grid step.
    tb = min(block_b, _round_up(B, 8))
    b_pad = _round_up(B, tb)
    if b_pad != B:
        x = jnp.pad(x, ((0, b_pad - B), (0, 0)))
    grid = (b_pad // tb,)

    out = pl.pallas_call(
        functools.partial(policy_kernel, pi_out=pi_out),
        out_shape=jax.ShapeDtypeStruct((b_pad, pad_out), jnp.float32),
        grid_spec=pltpu.PrefetchScalarGridSpec(
            num_scalar_prefetch=0,
            grid=grid,
            in_specs=[
                # Activations: one batch tile per grid step.
                pl.BlockSpec((tb, pi_in), lambda i: (i, 0)),
                # Combined weight: constant block index -> stays VMEM-resident.
                pl.BlockSpec((pi_in, pad_out), lambda i: (0, 0)),
            ],
            out_specs=pl.BlockSpec((tb, pad_out), lambda i: (i, 0)),
        ),
        compiler_params=pltpu.CompilerParams(
            dimension_semantics=("parallel",),  # batch tiles are independent
        ),
    )(x, wc_padded)

    out = out[:B, :pi_out]  # drop batch padding + lane padding
    if squeeze:
        out = out[0]
    return out


def _torch_linear_init(key, out_features, in_features):
    # Deterministic stand-in for nn.Linear default init: U(-1/sqrt(fan_in), +1/sqrt(fan_in))
    bound = 1.0 / jnp.sqrt(jnp.float32(in_features))
    return jax.random.uniform(
        key, (out_features, in_features), dtype=jnp.float32,
        minval=-bound, maxval=bound,
    )


if __name__ == "__main__":
    # GraphGame(6, ...) flattened state and 4 actions -> pi_in = 6*6 = 36, pi_out = 4.
    pi_in, pi_out, num_neurons = 36, 4, 256
    B = 256  # batch of flattened states (2 grid tiles of 128 -> exercises parallel grid)

    key = jax.random.PRNGKey(0)
    k_x, k_w1, k_w2 = jax.random.split(key, 3)

    x = jax.random.normal(k_x, (B, pi_in), dtype=jnp.float32)
    w1 = _torch_linear_init(k_w1, num_neurons, pi_in)   # Linear(pi_in, 256, bias=False)
    w2 = _torch_linear_init(k_w2, pi_out, num_neurons)  # Linear(256, pi_out, bias=False)

    # One-time weight prep (collapse + lane padding), then the fast forward.
    wc_padded, n_actions = prepare_policy_weights(w1, w2)

    out = policy_network_forward(x, wc_padded, n_actions)
    out = jax.block_until_ready(out)

    # Also exercise the single-state (1-D) path used by play_episode_*.
    out1 = policy_network_forward(x[0], wc_padded, n_actions)
    out1 = jax.block_until_ready(out1)

    # Correctness check against a pure-JAX reference of the PyTorch forward.
    ref = jax.nn.softmax((x @ w1.T) @ w2.T, axis=-1)
    assert out.shape == (B, pi_out)
    assert jnp.allclose(out, ref, atol=1e-4, rtol=1e-4), "mismatch vs reference"
    assert jnp.allclose(jnp.sum(out, axis=-1), 1.0, atol=1e-5), "softmax rows must sum to 1"
    assert out1.shape == (pi_out,)
    assert jnp.allclose(out1, ref[0], atol=1e-4, rtol=1e-4), "1-D path mismatch"

    print("KERNEL_OK")
</pallas_src>

<mosaic_0001>
module attributes {stable_mosaic.version = 11 : i64} {
  func.func @policy_kernel(%arg0: i32, %arg1: memref<128x36xf32, #tpu.memory_space<vmem>>, %arg2: memref<36x128xf32, #tpu.memory_space<vmem>>, %arg3: memref<128x128xf32, #tpu.memory_space<vmem>>) attributes {dimension_semantics = [#tpu.dimension_semantics<parallel>], iteration_bounds = array<i64: 2>, scalar_prefetch = 0 : i64, scratch_operands = 0 : i64, tpu.core_type = #tpu.core_type<tc>, window_params = [{transform_indices = @transform_0, window_bounds = array<i64: 128, 36>}, {pipeline_mode = #tpu.pipeline_mode<synchronous>, transform_indices = @transform_1, window_bounds = array<i64: 36, 128>}, {transform_indices = @transform_2, window_bounds = array<i64: 128, 128>}]} {
    %c0 = arith.constant 0 : index
    %c0_0 = arith.constant 0 : index
    %0 = vector.load %arg1[%c0, %c0_0] : memref<128x36xf32, #tpu.memory_space<vmem>>, vector<128x36xf32>
    %c0_1 = arith.constant 0 : index
    %c0_2 = arith.constant 0 : index
    %1 = vector.load %arg2[%c0_1, %c0_2] : memref<36x128xf32, #tpu.memory_space<vmem>>, vector<36x128xf32>
    %cst = arith.constant dense<0.000000e+00> : vector<128x128xf32>
    %2 = tpu.matmul %0, %1, %cst {dimension_numbers = #tpu.dot_dimension_numbers<[1], [0], [0], [1], [0, 0, 1, 1], [], []>} : vector<128x36xf32>, vector<36x128xf32>, vector<128x128xf32> -> vector<128x128xf32>
    %3 = tpu.iota {dimensions = array<i32: 1>} : vector<128x128xi32>
    %c4_i32 = arith.constant 4 : i32
    %4 = vector.broadcast %c4_i32 : i32 to vector<128x128xi32>
    %5 = arith.cmpi slt, %3, %4 : vector<128x128xi32>
    %cst_3 = arith.constant 0xFF800000 : f32
    %6 = vector.broadcast %cst_3 : f32 to vector<128x128xf32>
    %7 = arith.select %5, %2, %6 : vector<128x128xi1>, vector<128x128xf32>
    %cst_4 = arith.constant dense<0xFF800000> : vector<128xf32>
    %8 = vector.multi_reduction <maximumf>, %7, %cst_4 [1] : vector<128x128xf32> to vector<128xf32>
    %9 = vector.shape_cast %8 : vector<128xf32> to vector<128x1xf32>
    %10 = vector.broadcast %9 : vector<128x1xf32> to vector<128x128xf32>
    %11 = arith.subf %7, %10 : vector<128x128xf32>
    %12 = math.exp %11 : vector<128x128xf32>
    %cst_5 = arith.constant dense<0.000000e+00> : vector<128xf32>
    %13 = vector.multi_reduction <add>, %12, %cst_5 [1] : vector<128x128xf32> to vector<128xf32>
    %14 = vector.shape_cast %13 : vector<128xf32> to vector<128x1xf32>
    %15 = tpu.reciprocal %14 : vector<128x1xf32> -> vector<128x1xf32>
    %16 = vector.broadcast %15 : vector<128x1xf32> to vector<128x128xf32>
    %17 = arith.mulf %12, %16 : vector<128x128xf32>
    %c0_6 = arith.constant 0 : index
    %c0_7 = arith.constant 0 : index
    %18 = vector.load %arg3[%c0_6, %c0_7] : memref<128x128xf32, #tpu.memory_space<vmem>>, vector<128x128xf32>
    tpu.vector_store %arg3[%c0_6, %c0_7], %17 {strides = array<i32>} : memref<128x128xf32, #tpu.memory_space<vmem>>, vector<128x128xf32>,
    return
  }
  func.func @transform_0(%arg0: i32) -> (i32, i32) {
    %c0_i32 = arith.constant 0 : i32
    %c0_i32_0 = arith.constant 0 : i32
    return %arg0, %c0_i32 : i32, i32
  }
  func.func @transform_1(%arg0: i32) -> (i32, i32) {
    %c0_i32 = arith.constant 0 : i32
    %c0_i32_0 = arith.constant 0 : i32
    %c0_i32_1 = arith.constant 0 : i32
    return %c0_i32, %c0_i32_0 : i32, i32
  }
  func.func @transform_2(%arg0: i32) -> (i32, i32) {
    %c0_i32 = arith.constant 0 : i32
    %c0_i32_0 = arith.constant 0 : i32
    return %arg0, %c0_i32 : i32, i32
  }
}

</mosaic_0001>

<bundles_post_ra>
// kernel: tpu_custom_call.1
= control target key start
LH: loop header
LB: loop body
LE: loop exit
PB: predicated region body
PF: predicated region fallthrough
CT: control target
= control target key end

     0   :  { %7 = vsyncpa [#allocation3], 0  ;;  %s1183_s0 = inlined_call_operand.vmem [shape: f32[256,36], index: 0, kind: input, shape index: {}]   ;;  %s1184_s1 = inlined_call_operand.vmem [shape: f32[36,128], index: 1, kind: input, shape index: {}]   ;;  %s1185_s2 = inlined_call_operand.hbm [shape: f32[256,128], index: 2, kind: output, shape index: {}]  }
   0x1   :  { %9 = vsyncpa [#allocation3 + $0x1], 0  ;;  %s905_s9 = smov 0   ;;  %s907_s10 = smov 0  }
   0x2   :  { %s909_s11 = smov 0   ;;  %s911_s12 = smov 0  }
   0x3 LB: > { %s926_s13 = sadd.s32 4294967295, %s885_s12   ;;  %s619_s14 = sadd.s32 4294967294, %s885_s12   ;;  %s885_s12 = sphi %s911_s12, %s1191_s12   ;;  %s881_s11 = sphi %s909_s11, %s1190_s11   ;;  %s877_s10 = sphi %s907_s10, %s1189_s10   ;;  %s873_s9 = sphi %s905_s9, %s1188_s9  }
   0x4   : > { %s930_s15 = sadd.s32 1, %s885_s12   ;;  %s69_s16 = sadd.s32 1, %s881_s11 }
   0x5   : > { %s66_s17 = ssub.s32 %s885_s12, %s930_s15  ;;  %p79_p0 = scmp.ne.s32.totalorder %s881_s11, %s877_s10 }
   0x6   : > { %p67_p1 = scmp.eq.s32.totalorder %s66_s17, 0  ;;  %p80_p2 = scmp.eq.s32.totalorder %s926_s13, 1 }
   0x7   : > { %p85_p3 = scmp.ne.s32.totalorder %s877_s10, %s873_s9  ;;  %p86_p4 = scmp.eq.s32.totalorder %s619_s14, 1 }
   0x8   : > { %s941_s18 = scalar_select %p67_p1, %s881_s11, %s69_s16  }
   0x9   : > { %p943_p5 = por %p80_p2, %p79_p0  ;;  %p947_p6 = por %p86_p4, %p85_p3 }
   0xa   : > { %p622_p7 = scmp.ge.s32.totalorder %s885_s12, 1  ;;  %p116_p8 = scmp.lt.s32.totalorder %s885_s12, 3 }
   0xc   : > { %p117_p9 = pnand %p622_p7, %p116_p8 }
   0xd   : > { %v161_v0 = vld [vmem:[%s1184_s1] sm:$0xff] (!%p117_p9)  ;;  %v162_v1 = vld [vmem:[%s1184_s1 + $0x8] sm:$0xff] (!%p117_p9)  ;;  %v163_v2 = vld [vmem:[%s1184_s1 + $0x10] sm:$0xff] (!%p117_p9)  ;;  %s624_s27 = sshll.u32 (!%p117_p9), %s926_s13, 4  ;;  %vm215_vm0 = vcmask (!%p117_p9), 1043456   ;;  %vm166_vm1 = vcmask (!%p117_p9), 293888   ;;  %v364_v23 = vlaneseq (!%p117_p9) }
   0xe   : > { %120 = sbr.rel (%p117_p9) target bundleno = 601 (0x259), region = 28  ;;  %v704_v3 = vpack.c.bf16 (!%p117_p9), %v162_v1, %v161_v0  ;;  %v164_v4 = vld [vmem:[%s1184_s1 + $0x18] sm:$0xff] (!%p117_p9)  ;;  %p139_p10 = scmp.lt.s32.totalorder (!%p117_p9), %s624_s27, 31  ;;  %v165_v6 = vld [vmem:[%s1184_s1 + $0x20] sm:$0xf] (!%p117_p9) }
   0xf   : > { %v708_v5 = vpack.c.bf16 (!%p117_p9), %v164_v4, %v163_v2  ;;  %v365_v24 = vand.u32 (!%p117_p9), 127, %v364_v23  ;;  %s135_s8 = sand.u32 (!%p117_p9), 1, %s877_s10   ;;  %s648_s17 = sshll.u32 (!%p117_p9), %s926_s13, 11 }
  0x10   : > { %705 = vmatprep.subr.bf16.mxu0 (!%p117_p9), %v704_v3  ;;  %712 = vmatprep.subr.bf16.mxu1 (!%p117_p9), %v704_v3  ;;  %s623_s14 = sshll.u32 (!%p117_p9), %s135_s8, 7  ;;  %s1134_s24 = scalar_lea.hbm (!%p117_p9), %s1185_s2, %s648_s17 }
  0x11   : > { %707 = vmatpush3.bf16.msra.mxu0 (!%p117_p9), %v704_v3  ;;  %715 = vmatpush3.bf16.msra.mxu1 (!%p117_p9), %v704_v3  ;;  %vm366_vm2 = vcmp.lt.s32.totalorder (!%p117_p9), %v365_v24, 4  ;;  %s1098_s16 = scalar_lea.vmem (!%p117_p9), [#allocation2], %s623_s14  ;;  %s1142_s13 = scalar_lea.sflag (!%p117_p9), [#allocation3], %s135_s8 }
  0x12   : > { %709 = vmatprep.subr.bf16.mxu0 (!%p117_p9), %v708_v5  ;;  %713 = vmatprep.subr.bf16.mxu1 (!%p117_p9), %v708_v5  ;;  %s557_s21 = sshll.u32 (!%p117_p9), %s1098_s16, 4  ;;  %s887_s26 = smov (!%p117_p9), [#allocation2]   ;;  %s1136_s21 = int_to_ptr.vmem [resolvable:$true] %s557_s21 }
  0x13   : > { %s823_s25 = scalar_lea.vmem (!%p117_p9), %s1136_s21, 2048 }
  0x14   : > { %p824_p11 = scmp.ne.s32.totalorder (!%p117_p9), %s1136_s21, %s823_s25 }
  0x15   : > { %s1193_s27 = smov (!%p139_p10, %s624_s27), 31  ;;  %711 = vmatpush3.bf16.msra.mxu0 %v708_v5  ;;  %716 = vmatpush3.bf16.msra.mxu1 %v708_v5 }
  0x16   : > { %s625_s30 = sshll.u32 %s1193_s27, 3  ;;  %678 = vmatprep.subr.msk.mxu0 %vm215_vm0, %v165_v6  ;;  %714 = vmatprep.subr.msk.mxu1 %vm215_vm0, %v165_v6  ;;  %p825_p12 = pnand %p824_p11, %p943_p5 }
  0x17   : > { %s972_s7 = scalar_lea.vmem %s1183_s0, %s625_s30  ;;  %s827_s27 = sshll.u32 %s887_s26, 4  ;;  %s828_s27 = int_to_ptr.vmem [resolvable:$false] %s827_s27 }
  0x18   : > { %v145_v7 = vld [vmem:[%s972_s7] sm:$0xff]  ;;  %v146_v9 = vld [vmem:[%s972_s7 + $0x8] sm:$0xff]  ;;  %v147_v11 = vld [vmem:[%s972_s7 + $0x10] sm:$0xff]  ;;  %p826_p13 = pneg %p825_p12  ;;  %s829_s28 = scalar_lea.vmem %s828_s27, 4096 }
  0x19   : > { %v153_v8 = vld [vmem:[%s972_s7 + $0x40] sm:$0xff]  ;;  %680 = vmatprep.mubr.msk.f32.mxu0 %vm166_vm1, %v145_v7  ;;  %v154_v10 = vld [vmem:[%s972_s7 + $0x48] sm:$0xff]  ;;  %v155_v12 = vld [vmem:[%s972_s7 + $0x50] sm:$0xff]  ;;  %679 = vmatpush3.msk.msra.mxu0 %vm215_vm0, %v165_v6  ;;  %p830_p0 = scmp.lt.s32.totalorder %s1136_s21, %s828_s27  ;;  %p831_p1 = scmp.lt.s32.totalorder %s829_s28, %s823_s25 }
  0x1a   : > { %692 = vmatprep.mubr.msk.f32.mxu1 %vm166_vm1, %v153_v8  ;;  %717 = vmatpush3.msk.msra.mxu1 %vm215_vm0, %v165_v6  ;;  %v148_v13 = vld [vmem:[%s972_s7 + $0x18] sm:$0xff]  ;;  %v149_v15 = vld [vmem:[%s972_s7 + $0x20] sm:$0xff]  ;;  %v150_v17 = vld [vmem:[%s972_s7 + $0x28] sm:$0xff] }
  0x1b   : > { %681 = vmatmul.mubr.msk.f32.vlgmr.msra.gmra.mrb[0].mxu0 %vm166_vm1, %v146_v9  ;;  %693 = vmatmul.mubr.msk.f32.vlgmr.msra.gmra.mrb[0].mxu1 %vm166_vm1, %v154_v10  ;;  %v156_v14 = vld [vmem:[%s972_s7 + $0x58] sm:$0xff]  ;;  %v157_v16 = vld [vmem:[%s972_s7 + $0x60] sm:$0xff]  ;;  %v158_v18 = vld [vmem:[%s972_s7 + $0x68] sm:$0xff]  ;;  %p832_p2 = por %p831_p1, %p830_p0 }
  0x1c   : > { %683 = vmatprep.mubr.msk.f32.mxu0 %vm166_vm1, %v147_v11  ;;  %695 = vmatprep.mubr.msk.f32.mxu1 %vm166_vm1, %v155_v12  ;;  %v151_v19 = vld [vmem:[%s972_s7 + $0x30] sm:$0xff]  ;;  %v152_v21 = vld [vmem:[%s972_s7 + $0x38] sm:$0xff] }
  0x1d   : > { %v159_v20 = vld [vmem:[%s972_s7 + $0x70] sm:$0xff]  ;;  %v160_v22 = vld [vmem:[%s972_s7 + $0x78] sm:$0xff]  ;;  %p833_p3 = pnand %p832_p2, %p826_p13 }
  0x1f   : > { %684 = vmatmul.mubr.msk.f32.gmra.mrb[2].mxu0 %vm166_vm1, %v148_v13  ;;  %696 = vmatmul.mubr.msk.f32.gmra.mrb[2].mxu1 %vm166_vm1, %v156_v14 }
  0x20   : > { %686 = vmatprep.mubr.msk.f32.mxu0 %vm166_vm1, %v149_v15  ;;  %698 = vmatprep.mubr.msk.f32.mxu1 %vm166_vm1, %v157_v16 }
  0x23   : > { %687 = vmatmul.mubr.msk.f32.gmra.mrb[4].mxu0 %vm166_vm1, %v150_v17  ;;  %699 = vmatmul.mubr.msk.f32.gmra.mrb[4].mxu1 %vm166_vm1, %v158_v18 }
  0x24   : > { %689 = vmatprep.mubr.msk.f32.mxu0 %vm166_vm1, %v151_v19  ;;  %701 = vmatprep.mubr.msk.f32.mxu1 %vm166_vm1, %v159_v20 }
  0x27   : > { %690 = vmatmul.mubr.msk.f32.gmra.mrb[6].mxu0 %vm166_vm1, %v152_v21  ;;  %702 = vmatmul.mubr.msk.f32.gmra.mrb[6].mxu1 %vm166_vm1, %v160_v22 }
  0xee   : > { %v682_v25 = vpop.f32.mrb[0].mxu0  ;;  %v694_v26 = vpop.f32.mrb[0].mxu1 }
  0xef   : > { %v285_v27 = vpop.f32.mrb[1].mxu0  ;;  %v325_v28 = vpop.f32.mrb[1].mxu1  ;;  %v376_v29 = vsel %vm366_vm2, %v694_v26, -inf  ;;  %v368_v30 = vsel %vm366_vm2, %v682_v25, -inf }
  0xf0   : > { %401 = vmax.xlane.f32.xlu1 %v376_v29  ;;  %385 = vmax.xlane.f32.xlu0 %v368_v30  ;;  %v367_v34 = vsel %vm366_vm2, %v285_v27, -inf  ;;  %v375_v40 = vsel %vm366_vm2, %v325_v28, -inf }
  0xf2   : > { %v685_v31 = vpop.f32.mrb[2].mxu0  ;;  %v697_v32 = vpop.f32.mrb[2].mxu1 }
  0xf3   : > { %v295_v33 = vpop.f32.mrb[3].mxu0  ;;  %v370_v35 = vsel %vm366_vm2, %v685_v31, -inf  ;;  %v335_v36 = vpop.f32.mrb[3].mxu1  ;;  %v378_v37 = vsel %vm366_vm2, %v697_v32, -inf }
  0xf4   : > { %383 = vmax.xlane.f32.xlu0 %v367_v34  ;;  %389 = vmax.xlane.f32.xlu1 %v370_v35  ;;  %v377_v45 = vsel %vm366_vm2, %v335_v36, -inf  ;;  %v369_v46 = vsel %vm366_vm2, %v295_v33, -inf }
  0xf6   : > { %v688_v38 = vpop.f32.mrb[4].mxu0  ;;  %v700_v39 = vpop.f32.mrb[4].mxu1 }
  0xf7   : > { %v305_v41 = vpop.f32.mrb[5].mxu0  ;;  %v345_v42 = vpop.f32.mrb[5].mxu1  ;;  %v372_v49 = vsel %vm366_vm2, %v688_v38, -inf  ;;  %v380_v51 = vsel %vm366_vm2, %v700_v39, -inf }
  0xf8   : > { %399 = vmax.xlane.f32.xlu0 %v375_v40  ;;  %405 = vmax.xlane.f32.xlu1 %v378_v37  ;;  %v371_v50 = vsel %vm366_vm2, %v305_v41, -inf  ;;  %v1022_v52 = vsel %vm366_vm2, %v345_v42, -inf }
  0xfa   : > { %v691_v43 = vpop.f32.mrb[6].mxu0  ;;  %v703_v44 = vpop.f32.mrb[6].mxu1 }
  0xfb   : > { %v315_v47 = vpop.f32.mrb[7].mxu0  ;;  %v355_v48 = vpop.f32.mrb[7].mxu1  ;;  %v1026_v53 = vsel %vm366_vm2, %v691_v43, -inf  ;;  %v1034_v55 = vsel %vm366_vm2, %v703_v44, -inf }
  0xfc   : > { %403 = vmax.xlane.f32.xlu0 %v377_v45  ;;  %387 = vmax.xlane.f32.xlu1 %v369_v46  ;;  %v1029_v54 = vsel %vm366_vm2, %v315_v47, -inf  ;;  %v1037_v56 = vsel %vm366_vm2, %v355_v48, -inf }
 0x100   : > { %393 = vmax.xlane.f32.xlu1 %v372_v49  ;;  %391 = vmax.xlane.f32.xlu0 %v371_v50 }
 0x104   : > { %409 = vmax.xlane.f32.xlu1 %v380_v51  ;;  %407 = vmax.xlane.f32.xlu0 %v1022_v52 }
 0x108   : > { %397 = vmax.xlane.f32.xlu1 %v1026_v53  ;;  %395 = vmax.xlane.f32.xlu0 %v1029_v54 }
 0x10c   : > { %413 = vmax.xlane.f32.xlu1 %v1034_v55  ;;  %411 = vmax.xlane.f32.xlu0 %v1037_v56 }
 0x17d   : > { %v402_v57 = vpop.xlane.xlu1 %401  ;;  %v386_v58 = vpop.xlane.xlu0 %385 }
 0x17e   : > { %v416_v59 = vsub.f32 %v368_v30, %v386_v58  ;;  %v424_v60 = vsub.f32 %v376_v29, %v402_v57 }
 0x180   : > { %v433_v61 = vmul.f32 1.442695, %v416_v59  ;;  %v449_v1 = vmul.f32 1.442695, %v424_v60 }
 0x181   : > { %v384_v62 = vpop.xlane.xlu0 %383  ;;  %v390_v63 = vpop.xlane.xlu1 %389 }
 0x182   : > { %v415_v0 = vsub.f32 %v367_v34, %v384_v62  ;;  %759 = vpow2.f32 %v433_v61  ;;  %v418_v2 = vsub.f32 %v370_v35, %v390_v63 }
 0x184   : > { %v431_v3 = vmul.f32 1.442695, %v415_v0  ;;  %v437_v8 = vmul.f32 1.442695, %v418_v2 }
 0x185   : > { %v400_v4 = vpop.xlane.xlu0 %399  ;;  %v406_v5 = vpop.xlane.xlu1 %405 }
 0x186   : > { %761 = vpow2.f32 %v431_v3  ;;  %v423_v6 = vsub.f32 %v375_v40, %v400_v4  ;;  %v426_v7 = vsub.f32 %v378_v37, %v406_v5 }
 0x187   : > { %763 = vpow2.f32 %v449_v1 }
 0x188   : > { %v447_v9 = vmul.f32 1.442695, %v423_v6  ;;  %v453_v12 = vmul.f32 1.442695, %v426_v7 }
 0x189   : > { %v404_v10 = vpop.xlane.xlu0 %403  ;;  %v388_v11 = vpop.xlane.xlu1 %387 }
 0x18a   : > { %765 = vpow2.f32 %v447_v9  ;;  %v417_v13 = vsub.f32 %v369_v46, %v388_v11  ;;  %v425_v14 = vsub.f32 %v377_v45, %v404_v10 }
 0x18b   : > { %767 = vpow2.f32 %v437_v8 }
 0x18c   : > { %v435_v15 = vmul.f32 1.442695, %v417_v13  ;;  %v1041_v16 = vpop.eup %759  ;;  %769 = vpow2.f32 %v453_v12  ;;  %v451_v20 = vmul.f32 1.442695, %v425_v14 }
 0x18d   : > { %v394_v17 = vpop.xlane.xlu1 %393  ;;  %v392_v18 = vpop.xlane.xlu0 %391  ;;  %465 = vadd.xlane.f32.xlu1 %v1041_v16 }
 0x18e   : > { %v420_v19 = vsub.f32 %v372_v49, %v394_v17  ;;  %771 = vpow2.f32 %v435_v15  ;;  %v419_v21 = vsub.f32 %v371_v50, %v392_v18 }
 0x190   : > { %v1044_v22 = vpop.eup %761  ;;  %v441_v23 = vmul.f32 1.442695, %v420_v19  ;;  %v439_v28 = vmul.f32 1.442695, %v419_v21 }
 0x191   : > { %v1046_v24 = vpop.eup %763  ;;  %v410_v25 = vpop.xlane.xlu1 %409  ;;  %463 = vadd.xlane.f32.xlu0 %v1044_v22 }
 0x192   : > { %v408_v26 = vpop.xlane.xlu0 %407  ;;  %773 = vpow2.f32 %v441_v23  ;;  %v428_v27 = vsub.f32 %v380_v51, %v410_v25  ;;  %481 = vadd.xlane.f32.xlu1 %v1046_v24 }
 0x193   : > { %775 = vpow2.f32 %v451_v20  ;;  %v427_v29 = vsub.f32 %v1022_v52, %v408_v26 }
 0x194   : > { %v1051_v30 = vpop.eup %765  ;;  %v457_v31 = vmul.f32 1.442695, %v428_v27 }
 0x195   : > { %v1053_v32 = vpop.eup %767  ;;  %v398_v33 = vpop.xlane.xlu1 %397  ;;  %479 = vadd.xlane.f32.xlu0 %v1051_v30  ;;  %v455_v36 = vmul.f32 1.442695, %v427_v29 }
 0x196   : > { %v396_v34 = vpop.xlane.xlu0 %395  ;;  %777 = vpow2.f32 %v457_v31  ;;  %469 = vadd.xlane.f32.xlu1 %v1053_v32  ;;  %v422_v35 = vsub.f32 %v1026_v53, %v398_v33  ;;  %v1059_v38 = vpop.eup %769 }
 0x197   : > { %779 = vpow2.f32 %v439_v28  ;;  %v421_v37 = vsub.f32 %v1029_v54, %v396_v34 }
 0x198   : > { %v445_v39 = vmul.f32 1.442695, %v422_v35  ;;  %v1061_v40 = vpop.eup %771 }
 0x199   : > { %v414_v41 = vpop.xlane.xlu1 %413  ;;  %467 = vadd.xlane.f32.xlu0 %v1061_v40  ;;  %v443_v44 = vmul.f32 1.442695, %v421_v37 }
 0x19a   : > { %v412_v42 = vpop.xlane.xlu0 %411  ;;  %781 = vpow2.f32 %v445_v39  ;;  %485 = vadd.xlane.f32.xlu1 %v1059_v38  ;;  %v430_v43 = vsub.f32 %v1034_v55, %v414_v41 }
 0x19b   : > { %783 = vpow2.f32 %v455_v36  ;;  %v429_v45 = vsub.f32 %v1037_v56, %v412_v42 }
 0x19c   : > { %v1067_v46 = vpop.eup %773  ;;  %v461_v47 = vmul.f32 1.442695, %v430_v43 }
 0x19d   : > { %v1069_v48 = vpop.eup %775  ;;  %v459_v49 = vmul.f32 1.442695, %v429_v45 }
 0x19e   : > { %785 = vpow2.f32 %v461_v47  ;;  %473 = vadd.xlane.f32.xlu1 %v1067_v46  ;;  %483 = vadd.xlane.f32.xlu0 %v1069_v48 }
 0x19f   : > { %787 = vpow2.f32 %v443_v44 }
 0x1a0   : > { %v1073_v50 = vpop.eup %777  ;;  %789 = vpow2.f32 %v459_v49 }
 0x1a1   : > { %v1075_v51 = vpop.eup %779 }
 0x1a2   : > { %489 = vadd.xlane.f32.xlu1 %v1073_v50  ;;  %471 = vadd.xlane.f32.xlu0 %v1075_v51 }
 0x1a4   : > { %v1079_v52 = vpop.eup %781 }
 0x1a5   : > { %v1081_v53 = vpop.eup %783 }
 0x1a6   : > { %477 = vadd.xlane.f32.xlu1 %v1079_v52  ;;  %487 = vadd.xlane.f32.xlu0 %v1081_v53 }
 0x1a8   : > { %v1085_v54 = vpop.eup %785 }
 0x1a9   : > { %v1087_v55 = vpop.eup %787 }
 0x1aa   : > { %493 = vadd.xlane.f32.xlu1 %v1085_v54  ;;  %475 = vadd.xlane.f32.xlu0 %v1087_v55  ;;  %v1091_v56 = vpop.eup %789 }
 0x1ae   : > { %491 = vadd.xlane.f32.xlu0 %v1091_v56 }
 0x21a   : > { %v466_v57 = vpop.xlane.xlu1 %465 }
 0x21b   : > { %791 = vrcp.f32 %v466_v57 }
 0x21e   : > { %v464_v58 = vpop.xlane.xlu0 %463 }
 0x21f   : > { %v482_v59 = vpop.xlane.xlu1 %481  ;;  %793 = vrcp.f32 %v464_v58 }
 0x220   : > { %795 = vrcp.f32 %v482_v59 }
 0x222   : > { %v480_v60 = vpop.xlane.xlu0 %479 }
 0x223   : > { %v470_v61 = vpop.xlane.xlu1 %469  ;;  %797 = vrcp.f32 %v480_v60 }
 0x224   : > { %799 = vrcp.f32 %v470_v61 }
 0x225   : > { %v792_v62 = vpop.eup %791 }
 0x226   : > { %v512_v63 = vmul.f32 %v792_v62, %v1041_v16  ;;  %v468_v1 = vpop.xlane.xlu0 %467 }
 0x227   : > { %v486_v0 = vpop.xlane.xlu1 %485 }
 0x228   : > { %801 = vrcp.f32 %v486_v0  ;;  %528 = vst [vmem:[%s1098_s16 + $0x8] sm:$0xff] %v512_v63 }
 0x229   : > { %v794_v2 = vpop.eup %793  ;;  %803 = vrcp.f32 %v468_v1 }
 0x22a   : > { %v796_v3 = vpop.eup %795  ;;  %v511_v4 = vmul.f32 %v794_v2, %v1044_v22 }
 0x22b   : > { %v520_v5 = vmul.f32 %v796_v3, %v1046_v24  ;;  %v474_v6 = vpop.xlane.xlu1 %473  ;;  %v484_v7 = vpop.xlane.xlu0 %483 }
 0x22c   : > { %527 = vst [vmem:[%s1098_s16] sm:$0xff] %v511_v4  ;;  %805 = vrcp.f32 %v474_v6 }
 0x22d   : > { %v798_v8 = vpop.eup %797  ;;  %536 = vst [vmem:[%s1098_s16 + $0x48] sm:$0xff] %v520_v5  ;;  %807 = vrcp.f32 %v484_v7 }
 0x22e   : > { %v800_v9 = vpop.eup %799  ;;  %v519_v10 = vmul.f32 %v798_v8, %v1051_v30 }
 0x22f   : > { %v514_v11 = vmul.f32 %v800_v9, %v1053_v32  ;;  %v490_v12 = vpop.xlane.xlu1 %489  ;;  %v472_v13 = vpop.xlane.xlu0 %471 }
 0x230   : > { %535 = vst [vmem:[%s1098_s16 + $0x40] sm:$0xff] %v519_v10  ;;  %809 = vrcp.f32 %v490_v12 }
 0x231   : > { %530 = vst [vmem:[%s1098_s16 + $0x18] sm:$0xff] %v514_v11  ;;  %811 = vrcp.f32 %v472_v13 }
 0x232   : > { %v802_v14 = vpop.eup %801 }
 0x233   : > { %v804_v15 = vpop.eup %803  ;;  %v522_v16 = vmul.f32 %v802_v14, %v1059_v38  ;;  %v478_v17 = vpop.xlane.xlu1 %477 }
 0x234   : > { %v488_v18 = vpop.xlane.xlu0 %487  ;;  %v513_v19 = vmul.f32 %v804_v15, %v1061_v40  ;;  %813 = vrcp.f32 %v478_v17 }
 0x235   : > { %538 = vst [vmem:[%s1098_s16 + $0x58] sm:$0xff] %v522_v16  ;;  %815 = vrcp.f32 %v488_v18 }
 0x236   : > { %v806_v20 = vpop.eup %805  ;;  %529 = vst [vmem:[%s1098_s16 + $0x10] sm:$0xff] %v513_v19 }
 0x237   : > { %v808_v21 = vpop.eup %807  ;;  %v516_v22 = vmul.f32 %v806_v20, %v1067_v46  ;;  %v494_v23 = vpop.xlane.xlu1 %493 }
 0x238   : > { %v476_v24 = vpop.xlane.xlu0 %475  ;;  %v521_v25 = vmul.f32 %v808_v21, %v1069_v48  ;;  %817 = vrcp.f32 %v494_v23 }
 0x239   : > { %532 = vst [vmem:[%s1098_s16 + $0x28] sm:$0xff] %v516_v22  ;;  %819 = vrcp.f32 %v476_v24 }
 0x23a   : > { %v810_v26 = vpop.eup %809  ;;  %537 = vst [vmem:[%s1098_s16 + $0x50] sm:$0xff] %v521_v25 }
 0x23b   : > { %v812_v27 = vpop.eup %811  ;;  %v524_v28 = vmul.f32 %v810_v26, %v1073_v50 }
 0x23c   : > { %v492_v29 = vpop.xlane.xlu0 %491  ;;  %v515_v30 = vmul.f32 %v812_v27, %v1075_v51 }
 0x23d   : > { %821 = vrcp.f32 %v492_v29  ;;  %540 = vst [vmem:[%s1098_s16 + $0x68] sm:$0xff] %v524_v28 }
 0x23e   : > { %v814_v31 = vpop.eup %813  ;;  %531 = vst [vmem:[%s1098_s16 + $0x20] sm:$0xff] %v515_v30 }
 0x23f   : > { %v816_v32 = vpop.eup %815  ;;  %v518_v33 = vmul.f32 %v814_v31, %v1079_v52 }
 0x240   : > { %v523_v34 = vmul.f32 %v816_v32, %v1081_v53 }
 0x241   : > { %534 = vst [vmem:[%s1098_s16 + $0x38] sm:$0xff] %v518_v33 }
 0x242   : > { %v818_v35 = vpop.eup %817  ;;  %539 = vst [vmem:[%s1098_s16 + $0x60] sm:$0xff] %v523_v34 }
 0x243   : > { %v820_v36 = vpop.eup %819  ;;  %v526_v37 = vmul.f32 %v818_v35, %v1085_v54 }
 0x244   : > { %v517_v38 = vmul.f32 %v820_v36, %v1087_v55 }
 0x245   : > { %542 = vst [vmem:[%s1098_s16 + $0x78] sm:$0xff] %v526_v37 }
 0x246   : > { %533 = vst [vmem:[%s1098_s16 + $0x30] sm:$0xff] %v517_v38 }
 0x247   : > { %v822_v39 = vpop.eup %821 }
 0x248   : > { %v525_v40 = vmul.f32 %v822_v39, %v1091_v56 }
 0x24a   : > { %541 = vst [vmem:[%s1098_s16 + $0x70] sm:$0xff] %v525_v40 }
 0x24b   : > { %836 = shalt.err (!%p833_p3)
}
 0x24c   : > { %s837_s29 = scalar_lea.hbm %s1134_s24, 2048  ;;  %s841_s4 = scalar_lea.hbm %s1185_s2, 4096 }
 0x24d   : > { %p838_p4 = scmp.ne.s32.totalorder %s1134_s24, %s837_s29  ;;  %p842_p9 = scmp.lt.u32.totalorder %s1134_s24, %s1185_s2 }
 0x24e   : > { %p843_p10 = scmp.lt.u32.totalorder %s841_s4, %s837_s29  ;;  %p845_p12 = scmp.lt.u32.totalorder %s837_s29, %s1134_s24 }
 0x24f   : > { %p839_p7 = pnand %p838_p4, %p943_p5 }
 0x250   : > { %p844_p11 = por %p843_p10, %p842_p9 }
 0x251   : > { %p840_p8 = pneg %p839_p7 }
 0x252   : > { %p846_p13 = por %p845_p12, %p844_p11 }
 0x254   : > { %p847_p0 = pnand %p846_p13, %p840_p8 }
 0x256   : > { %850 = shalt.err (!%p847_p0)
}
 0x257   : > { %s888_s7 = smov 128   ;;  %s889_s8 = smov 8  }
 0x258   : > { %718 = dma.vmem_to_hbm [thread:$0]  (%p943_p5), %s1136_s21, 2048, %s1134_s24, %s1142_s13, %s888_s7, %s888_s7, %s889_s8  }
 0x259 PF: > { %p724_p1 = scmp.ge.s32.totalorder %s885_s12, 2  ;;  %s572_s14 = sand.u32 1, %s873_s9  }
 0x25a   : > { %s573_s16 = scalar_lea.sflag [#allocation3], %s572_s14 }
 0x25b   : > { %p721_p2 = pnand %p724_p1, %p947_p6 }
 0x25d   : > { %868 = dma.done.wait (!%p721_p2), %s573_s16, 2048  }
 0x25e   : > { %870 = vsyncadd (!%p721_p2), %s573_s16, 4294965248  ;;  %p12_p3 = scmp.ge.s32.totalorder %s930_s15, 4   ;;  %s1188_s9 = smov %s877_s10 }
 0x25f   : > { %s1189_s10 = smov %s881_s11  ;;  %s1190_s11 = smov %s941_s18 }
 0x260   : > { %s1191_s12 = smov %s930_s15  ;;  %14 = sbr.rel (!%p12_p3) target bundleno = 3 (0x3), region = 63 }
 0x267   :  { %578 = vsyncpa [#allocation3], 1 }
 0x268   :  { %580 = vsyncpa [#allocation3 + $0x1], 1 }

</bundles_post_ra>
